<compile_context>
chip_gen: v7x
topology: tpu7x:2x2x1
jax: 0.10.0
libtpu: 0.0.40
codegen_flags: <defaults>
</compile_context>

<pallas_src>
import functools

import jax
import jax.numpy as jnp
from jax.experimental import pallas as pl
from jax.experimental.pallas import tpu as pltpu

_SUBLANES = 8
_LANES = 128
_DEFAULT_BLOCK_ROWS = 8192          # (8192, 128) f32 = 4 MiB per stream per buffer
_VMEM_LIMIT_BYTES = 32 * 1024 * 1024


def _round_up(x, m):
    return ((x + m - 1) // m) * m


def _sublane_multiple(dtype):
    # Sub-32-bit dtypes pack along sublanes; keep block rows tile-aligned.
    return max(_SUBLANES, 32 // jnp.dtype(dtype).itemsize)


def _num_tensorcores():
    # 2 TensorCores per chip on v7x; 1 on v5e/v6e.  Wrong guess only affects
    # throughput, never correctness.
    try:
        kind = jax.devices()[0].device_kind.lower()
    except Exception:
        return 1
    return 2 if ("v7" in kind or "7x" in kind) else 1


def _bce_sum_plain(p, t):
    """Plain-JAX clamped-BCE sum (used for the <=127-element unaligned tail)."""
    p = p.astype(jnp.float32)
    t = t.astype(jnp.float32)
    log_p = jnp.maximum(jnp.log(p), -100.0)
    log_1mp = jnp.maximum(jnp.log(1.0 - p), -100.0)
    return jnp.sum(-(log_1mp + t * (log_p - log_1mp)))


def _bce_partial_kernel(p_ref, t_ref, out_ref, acc_ref, *,
                        block_rows, valid_rows, blocks_per_core):
    c = pl.program_id(0)
    i = pl.program_id(1)

    @pl.when(i == 0)
    def _():
        acc_ref[...] = jnp.zeros_like(acc_ref)

    # In-kernel upcast: stream the inputs in their native dtype, compute in f32.
    p = p_ref[...].astype(jnp.float32)
    t = t_ref[...].astype(jnp.float32)

    # PyTorch binary_cross_entropy clamps the log terms at -100.
    log_p = jnp.maximum(jnp.log(p), -100.0)
    log_1mp = jnp.maximum(jnp.log(1.0 - p), -100.0)
    # -(t*log_p + (1-t)*log_1mp) == -(log_1mp + t*(log_p - log_1mp))
    loss = -(log_1mp + t * (log_p - log_1mp))

    row0 = (c * blocks_per_core + i) * block_rows
    is_interior = row0 + block_rows <= valid_rows

    # Fast path: interior block, no masking work at all.
    @pl.when(is_interior)
    def _():
        acc_ref[...] += jnp.sum(
            loss.reshape(block_rows // _SUBLANES, _SUBLANES, _LANES), axis=0)

    # Boundary / clamped-duplicate block: rows >= valid_rows hold unspecified
    # data; a select (never a multiply) keeps any NaN/Inf out of the acc.
    @pl.when(jnp.logical_not(is_interior))
    def _():
        rows_idx = row0 + jax.lax.broadcasted_iota(
            jnp.int32, (block_rows, _LANES), 0)
        masked = jnp.where(rows_idx < valid_rows, loss, 0.0)
        acc_ref[...] += jnp.sum(
            masked.reshape(block_rows // _SUBLANES, _SUBLANES, _LANES), axis=0)

    @pl.when(i == pl.num_programs(1) - 1)
    def _():
        out_ref[0] = acc_ref[...]


def _bce_sum_kernel(p2d, t2d):
    """Sum of clamped BCE over a lane-aligned (rows, 128) pair of streams."""
    rows = p2d.shape[0]

    sub = max(_sublane_multiple(p2d.dtype), _sublane_multiple(t2d.dtype))
    block_rows = min(_DEFAULT_BLOCK_ROWS, _round_up(rows, sub))
    num_blocks = pl.cdiv(rows, block_rows)

    num_cores = max(1, min(_num_tensorcores(), num_blocks))
    blocks_per_core = pl.cdiv(num_blocks, num_cores)

    def in_map(c_idx, i_idx):
        # Clamp so every DMA stays inside the array; duplicate / out-of-range
        # blocks are zeroed by the in-kernel boundary mask.
        lb = jnp.minimum(c_idx * blocks_per_core + i_idx, num_blocks - 1)
        return (lb, 0)

    kernel = functools.partial(
        _bce_partial_kernel,
        block_rows=block_rows,
        valid_rows=rows,
        blocks_per_core=blocks_per_core,
    )

    total_elems = p2d.size
    bytes_accessed = (p2d.size * p2d.dtype.itemsize
                      + t2d.size * t2d.dtype.itemsize
                      + num_cores * _SUBLANES * _LANES * 4)
    cost = pl.CostEstimate(flops=8 * total_elems,
                           transcendentals=2 * total_elems,
                           bytes_accessed=bytes_accessed)

    partials = pl.pallas_call(
        kernel,
        out_shape=jax.ShapeDtypeStruct((num_cores, _SUBLANES, _LANES),
                                       jnp.float32),
        grid_spec=pltpu.PrefetchScalarGridSpec(
            num_scalar_prefetch=0,
            grid=(num_cores, blocks_per_core),
            in_specs=[pl.BlockSpec((block_rows, _LANES), in_map),
                      pl.BlockSpec((block_rows, _LANES), in_map)],
            out_specs=pl.BlockSpec((1, _SUBLANES, _LANES),
                                   lambda c_idx, i_idx: (c_idx, 0, 0)),
            scratch_shapes=[pltpu.VMEM((_SUBLANES, _LANES), jnp.float32)],
        ),
        compiler_params=pltpu.CompilerParams(
            dimension_semantics=("parallel", "arbitrary"),
            vmem_limit_bytes=_VMEM_LIMIT_BYTES),
        cost_estimate=cost,
    )(p2d, t2d)

    return jnp.sum(partials)


def bce_loss_2d(inputs, targets, ignored_label=None, size_average=True):
    """inputs: (N, C, H, W) probabilities in (0,1); targets: (N, H, W) in [0,1]."""
    if ignored_label is not None:
        # TODO(synk): ignored_label masking path (data-dependent boolean
        # gather) not implemented.
        raise NotImplementedError("ignored_label path not implemented")

    n, c, h, w = inputs.shape
    assert c == 1, "BCELoss2d (ignored_label=None) requires C == 1"

    # For C == 1 the transpose(1,2).transpose(2,3) is the identity on data,
    # so a free reshape replaces it (no layout copy of the probability stream).
    p_flat = inputs.reshape(-1)
    t_flat = targets.reshape(-1)

    # Only non-float dtypes are cast in the wrapper; float streams (f32/bf16)
    # go to the kernel natively and are upcast after the VMEM load.
    if not jnp.issubdtype(p_flat.dtype, jnp.floating):
        p_flat = p_flat.astype(jnp.float32)
    if not jnp.issubdtype(t_flat.dtype, jnp.floating):
        t_flat = t_flat.astype(jnp.float32)

    total = p_flat.shape[0]
    assert t_flat.shape[0] == total, "element counts must match (C must be 1)"

    lane_total = (total // _LANES) * _LANES

    loss_sum = jnp.float32(0.0)
    if lane_total < total:
        # <=127-element ragged tail: a few plain-JAX ops, no whole-array pad.
        loss_sum = loss_sum + _bce_sum_plain(p_flat[lane_total:],
                                             t_flat[lane_total:])
    if lane_total > 0:
        p2d = p_flat[:lane_total].reshape(lane_total // _LANES, _LANES)
        t2d = t_flat[:lane_total].reshape(lane_total // _LANES, _LANES)
        loss_sum = loss_sum + _bce_sum_kernel(p2d, t2d)

    if size_average:
        loss_sum = loss_sum / jnp.float32(total)
    return loss_sum


if __name__ == "__main__":
    key = jax.random.PRNGKey(0)
    k1, k2 = jax.random.split(key)

    N, C, H, W = 2, 1, 16, 16  # C must be 1 for this loss (see layout comment)
    logits = jax.random.normal(k1, (N, C, H, W), dtype=jnp.float32)
    inputs = jax.nn.sigmoid(logits)                       # probabilities in (0,1)
    targets = jax.random.uniform(k2, (N, H, W), dtype=jnp.float32)

    loss = bce_loss_2d(inputs, targets)
    loss = jax.block_until_ready(loss)

    # Reference check against plain-JAX BCE (same clamping as PyTorch).
    p = inputs.reshape(-1)
    t = targets.reshape(-1)
    ref = jnp.mean(-(t * jnp.maximum(jnp.log(p), -100.0)
                     + (1.0 - t) * jnp.maximum(jnp.log(1.0 - p), -100.0)))
    assert jnp.allclose(loss, ref, rtol=1e-5, atol=1e-6), (loss, ref)

    print("KERNEL_OK")
</pallas_src>

<mosaic_0001>
module attributes {stable_mosaic.version = 11 : i64} {
  func.func @_bce_partial_kernel(%arg0: i32, %arg1: i32, %arg2: memref<8x128xf32, #tpu.memory_space<vmem>>, %arg3: memref<8x128xf32, #tpu.memory_space<vmem>>, %arg4: memref<1x8x128xf32, #tpu.memory_space<vmem>>, %arg5: memref<8x128xf32, #tpu.memory_space<vmem>>) attributes {dimension_semantics = [#tpu.dimension_semantics<parallel>, #tpu.dimension_semantics<arbitrary>], iteration_bounds = array<i64: 1, 1>, scalar_prefetch = 0 : i64, scratch_operands = 1 : i64, tpu.core_type = #tpu.core_type<tc>, window_params = [{transform_indices = @transform_0, window_bounds = array<i64: 8, 128>}, {transform_indices = @transform_1, window_bounds = array<i64: 8, 128>}, {transform_indices = @transform_2, window_bounds = array<i64: 1, 8, 128>}]} {
    %c0_i32 = arith.constant 0 : i32
    %0 = arith.cmpi eq, %arg1, %c0_i32 : i32
    %1 = arith.extui %0 : i1 to i32
    %c0_i32_0 = arith.constant 0 : i32
    %2 = arith.cmpi ne, %1, %c0_i32_0 : i32
    scf.if %2 {
      %cst_12 = arith.constant 0.000000e+00 : f32
      %31 = vector.broadcast %cst_12 : f32 to vector<8x128xf32>
      %c0_13 = arith.constant 0 : index
      %c0_14 = arith.constant 0 : index
      %32 = vector.load %arg5[%c0_13, %c0_14] : memref<8x128xf32, #tpu.memory_space<vmem>>, vector<8x128xf32>
      tpu.vector_store %arg5[%c0_13, %c0_14], %31 {strides = array<i32>} : memref<8x128xf32, #tpu.memory_space<vmem>>, vector<8x128xf32>,
    } else {
    }
    %c0 = arith.constant 0 : index
    %c0_1 = arith.constant 0 : index
    %3 = vector.load %arg2[%c0, %c0_1] : memref<8x128xf32, #tpu.memory_space<vmem>>, vector<8x128xf32>
    %c0_2 = arith.constant 0 : index
    %c0_3 = arith.constant 0 : index
    %4 = vector.load %arg3[%c0_2, %c0_3] : memref<8x128xf32, #tpu.memory_space<vmem>>, vector<8x128xf32>
    %5 = math.log %3 : vector<8x128xf32>
    %cst = arith.constant -1.000000e+02 : f32
    %6 = vector.broadcast %cst : f32 to vector<8x128xf32>
    %7 = arith.maximumf %5, %6 : vector<8x128xf32>
    %cst_4 = arith.constant 1.000000e+00 : f32
    %8 = vector.broadcast %cst_4 : f32 to vector<8x128xf32>
    %9 = arith.subf %8, %3 : vector<8x128xf32>
    %10 = math.log %9 : vector<8x128xf32>
    %cst_5 = arith.constant -1.000000e+02 : f32
    %11 = vector.broadcast %cst_5 : f32 to vector<8x128xf32>
    %12 = arith.maximumf %10, %11 : vector<8x128xf32>
    %13 = arith.subf %7, %12 : vector<8x128xf32>
    %14 = arith.mulf %4, %13 : vector<8x128xf32>
    %15 = arith.addf %12, %14 : vector<8x128xf32>
    %cst_6 = arith.constant 0.000000e+00 : f32
    %16 = vector.broadcast %cst_6 : f32 to vector<8x128xf32>
    %17 = arith.subf %16, %15 : vector<8x128xf32>
    %c1_i32 = arith.constant 1 : i32
    %18 = arith.muli %arg0, %c1_i32 : i32
    %19 = arith.addi %18, %arg1 : i32
    %c8_i32 = arith.constant 8 : i32
    %20 = arith.muli %19, %c8_i32 : i32
    %c8_i32_7 = arith.constant 8 : i32
    %21 = arith.addi %20, %c8_i32_7 : i32
    %c4_i32 = arith.constant 4 : i32
    %22 = arith.cmpi sle, %21, %c4_i32 : i32
    %23 = arith.extui %22 : i1 to i32
    %c0_i32_8 = arith.constant 0 : i32
    %24 = arith.cmpi ne, %23, %c0_i32_8 : i32
    scf.if %24 {
      %c0_12 = arith.constant 0 : index
      %c0_13 = arith.constant 0 : index
      %31 = vector.load %arg5[%c0_12, %c0_13] : memref<8x128xf32, #tpu.memory_space<vmem>>, vector<8x128xf32>
      %32 = vector.shape_cast %17 : vector<8x128xf32> to vector<1x8x128xf32>
      %cst_14 = arith.constant dense<0.000000e+00> : vector<8x128xf32>
      %33 = vector.multi_reduction <add>, %32, %cst_14 [0] : vector<1x8x128xf32> to vector<8x128xf32>
      %34 = arith.addf %31, %33 : vector<8x128xf32>
      %c0_15 = arith.constant 0 : index
      %c0_16 = arith.constant 0 : index
      %35 = vector.load %arg5[%c0_15, %c0_16] : memref<8x128xf32, #tpu.memory_space<vmem>>, vector<8x128xf32>
      tpu.vector_store %arg5[%c0_15, %c0_16], %34 {strides = array<i32>} : memref<8x128xf32, #tpu.memory_space<vmem>>, vector<8x128xf32>,
    } else {
    }
    %true = arith.constant true
    %25 = arith.xori %22, %true : i1
    %26 = arith.extui %25 : i1 to i32
    %c0_i32_9 = arith.constant 0 : i32
    %27 = arith.cmpi ne, %26, %c0_i32_9 : i32
    scf.if %27 {
      %31 = tpu.iota {dimensions = array<i32: 0>} : vector<8x128xi32>
      %32 = vector.broadcast %20 : i32 to vector<8x128xi32>
      %33 = arith.addi %32, %31 : vector<8x128xi32>
      %c4_i32_12 = arith.constant 4 : i32
      %34 = vector.broadcast %c4_i32_12 : i32 to vector<8x128xi32>
      %35 = arith.cmpi slt, %33, %34 : vector<8x128xi32>
      %cst_13 = arith.constant 0.000000e+00 : f32
      %36 = vector.broadcast %cst_13 : f32 to vector<8x128xf32>
      %37 = arith.select %35, %17, %36 : vector<8x128xi1>, vector<8x128xf32>
      %c0_14 = arith.constant 0 : index
      %c0_15 = arith.constant 0 : index
      %38 = vector.load %arg5[%c0_14, %c0_15] : memref<8x128xf32, #tpu.memory_space<vmem>>, vector<8x128xf32>
      %39 = vector.shape_cast %37 : vector<8x128xf32> to vector<1x8x128xf32>
      %cst_16 = arith.constant dense<0.000000e+00> : vector<8x128xf32>
      %40 = vector.multi_reduction <add>, %39, %cst_16 [0] : vector<1x8x128xf32> to vector<8x128xf32>
      %41 = arith.addf %38, %40 : vector<8x128xf32>
      %c0_17 = arith.constant 0 : index
      %c0_18 = arith.constant 0 : index
      %42 = vector.load %arg5[%c0_17, %c0_18] : memref<8x128xf32, #tpu.memory_space<vmem>>, vector<8x128xf32>
      tpu.vector_store %arg5[%c0_17, %c0_18], %41 {strides = array<i32>} : memref<8x128xf32, #tpu.memory_space<vmem>>, vector<8x128xf32>,
    } else {
    }
    %c0_i32_10 = arith.constant 0 : i32
    %28 = arith.cmpi eq, %arg1, %c0_i32_10 : i32
    %29 = arith.extui %28 : i1 to i32
    %c0_i32_11 = arith.constant 0 : i32
    %30 = arith.cmpi ne, %29, %c0_i32_11 : i32
    scf.if %30 {
      %c0_12 = arith.constant 0 : index
      %c0_13 = arith.constant 0 : index
      %31 = vector.load %arg5[%c0_12, %c0_13] : memref<8x128xf32, #tpu.memory_space<vmem>>, vector<8x128xf32>
      %c0_14 = arith.constant 0 : index
      %c0_15 = arith.constant 0 : index
      %c0_16 = arith.constant 0 : index
      %32 = vector.load %arg4[%c0_14, %c0_15, %c0_16] : memref<1x8x128xf32, #tpu.memory_space<vmem>>, vector<1x8x128xf32>
      %33 = vector.shape_cast %32 : vector<1x8x128xf32> to vector<8x128xf32>
      %34 = vector.shape_cast %31 : vector<8x128xf32> to vector<1x8x128xf32>
      tpu.vector_store %arg4[%c0_14, %c0_15, %c0_16], %34 {strides = array<i32>} : memref<1x8x128xf32, #tpu.memory_space<vmem>>, vector<1x8x128xf32>,
    } else {
    }
    return
  }
  func.func @transform_0(%arg0: i32, %arg1: i32) -> (i32, i32) {
    %c1_i32 = arith.constant 1 : i32
    %0 = arith.muli %arg0, %c1_i32 : i32
    %1 = arith.addi %0, %arg1 : i32
    %c0_i32 = arith.constant 0 : i32
    %2 = arith.minsi %1, %c0_i32 : i32
    %c0_i32_0 = arith.constant 0 : i32
    %c0_i32_1 = arith.constant 0 : i32
    return %2, %c0_i32_0 : i32, i32
  }
  func.func @transform_1(%arg0: i32, %arg1: i32) -> (i32, i32) {
    %c1_i32 = arith.constant 1 : i32
    %0 = arith.muli %arg0, %c1_i32 : i32
    %1 = arith.addi %0, %arg1 : i32
    %c0_i32 = arith.constant 0 : i32
    %2 = arith.minsi %1, %c0_i32 : i32
    %c0_i32_0 = arith.constant 0 : i32
    %c0_i32_1 = arith.constant 0 : i32
    return %2, %c0_i32_0 : i32, i32
  }
  func.func @transform_2(%arg0: i32, %arg1: i32) -> (i32, i32, i32) {
    %c0_i32 = arith.constant 0 : i32
    %c0_i32_0 = arith.constant 0 : i32
    %c0_i32_1 = arith.constant 0 : i32
    return %arg0, %c0_i32, %c0_i32_0 : i32, i32, i32
  }
}

</mosaic_0001>

<bundles_post_ra>
// kernel: tpu_custom_call.1
= control target key start
LH: loop header
LB: loop body
LE: loop exit
PB: predicated region body
PF: predicated region fallthrough
CT: control target
= control target key end

     0   :  { %7 = vsyncpa [#allocation4], 0  ;;  %s277_s0 = inlined_call_operand.hbm [shape: f32[4,128], index: 0, kind: input, shape index: {}]   ;;  %s278_s1 = inlined_call_operand.hbm [shape: f32[4,128], index: 1, kind: input, shape index: {}]   ;;  %s279_s2 = inlined_call_operand.hbm [shape: f32[1,8,128], index: 2, kind: output, shape index: {}]  }
   0x1   :  { %8 = vsyncpa [#allocation7], 0 }
   0x2   :  { %9 = vsyncpa [#allocation5], 0 }
   0x3   :  { %20 = vsyncadd [#allocation4], 64  ;;  %s221_s9 = smov [#allocation3]   ;;  %s149_s13 = scalar_lea.hbm %s277_s0, 64 }
   0x4   :  { %s25_s10 = sshll.u32 %s221_s9, 4  ;;  %p150_p0 = scmp.ne.s32.totalorder %s277_s0, %s149_s13  ;;  %s26_s10 = int_to_ptr.vmem [resolvable:$true] %s25_s10 }
   0x5   :  { %p153_p1 = scmp.lt.u32.totalorder %s149_s13, %s277_s0 }
   0x7   :  { %p155_p2 = pnand %p153_p1, %p150_p0 }
   0x9   :  { %158 = shalt.err (!%p155_p2)
}
   0xa   :  { %s159_s18 = scalar_lea.vmem %s26_s10, 64  ;;  %s163_s19 = scalar_lea.vmem %s26_s10, 128 }
   0xb   :  { %p160_p3 = scmp.ne.s32.totalorder %s26_s10, %s159_s18  ;;  %p164_p4 = scmp.lt.s32.totalorder %s26_s10, %s26_s10 }
   0xc   :  { %p165_p5 = scmp.lt.s32.totalorder %s163_s19, %s159_s18 }
   0xe   :  { %p166_p6 = por %p165_p5, %p164_p4 }
  0x10   :  { %p167_p7 = pnand %p166_p6, %p160_p3 }
  0x12   :  { %170 = shalt.err (!%p167_p7)
}
  0x13   :  { %s222_s20 = smov 64   ;;  %s223_s21 = smov 4  }
  0x14   :  { %31 = dma.hbm_to_vmem [thread:$0]  %s277_s0, 64, %s26_s10, [#allocation4], %s222_s20, %s222_s20, %s223_s21  }
  0x15   :  { %42 = vsyncadd [#allocation7], 64  ;;  %s224_s24 = smov [#allocation6]   ;;  %s171_s28 = scalar_lea.hbm %s278_s1, 64 }
  0x16   :  { %s47_s25 = sshll.u32 %s224_s24, 4  ;;  %p172_p8 = scmp.ne.s32.totalorder %s278_s1, %s171_s28  ;;  %s48_s25 = int_to_ptr.vmem [resolvable:$true] %s47_s25 }
  0x17   :  { %p175_p9 = scmp.lt.u32.totalorder %s171_s28, %s278_s1 }
  0x19   :  { %p177_p10 = pnand %p175_p9, %p172_p8 }
  0x1b   :  { %180 = shalt.err (!%p177_p10)
}
  0x1c   :  { %s181_s5 = scalar_lea.vmem %s48_s25, 64  ;;  %s185_s0 = scalar_lea.vmem %s48_s25, 128 }
  0x1d   :  { %p182_p11 = scmp.ne.s32.totalorder %s48_s25, %s181_s5  ;;  %p186_p12 = scmp.lt.s32.totalorder %s48_s25, %s48_s25 }
  0x1e   :  { %p187_p13 = scmp.lt.s32.totalorder %s185_s0, %s181_s5 }
  0x20   :  { %p188_p0 = por %p187_p13, %p186_p12 }
  0x22   :  { %p189_p1 = pnand %p188_p0, %p182_p11 }
  0x24   :  { %192 = shalt.err (!%p189_p1)
}
  0x25   :  { %53 = dma.hbm_to_vmem [thread:$0]  %s278_s1, 64, %s48_s25, [#allocation7], %s222_s20, %s222_s20, %s223_s21  }
  0x26   :  { %215 = dma.done.wait [#allocation4], 128  }
  0x27   :  { %216 = vsyncadd [#allocation4], 4294967168 }
  0x28   :  { %217 = dma.done.wait [#allocation7], 128  }
  0x29   :  { %218 = vsyncadd [#allocation7], 4294967168  ;;  %v77_v0 = vld [vmem:[#allocation3] sm:$0xff]  ;;  %v105_v7 = vlaneseq  ;;  %v78_v9 = vld [vmem:[#allocation6] sm:$0xff]  ;;  %s225_s1 = smov [#allocation8]  }
  0x2a   :  { %145 = vlog2.f32 %v77_v0  ;;  %v82_v1 = vsub.f32 1.0, %v77_v0  ;;  %s126_s8 = sshll.u32 %s225_s1, 4  ;;  %s127_s8 = int_to_ptr.vmem [resolvable:$true] %s126_s8 }
  0x2b   :  { %v106_v11 = vshrl.u32 %v105_v7, 7  ;;  %s193_s9 = scalar_lea.vmem %s127_s8, 128  ;;  %p198_p3 = scmp.lt.s32.totalorder %s127_s8, %s127_s8 }
  0x2c   :  { %147 = vlog2.f32 %v82_v1  ;;  %p194_p2 = scmp.ne.s32.totalorder %s127_s8, %s193_s9  ;;  %p199_p4 = scmp.lt.s32.totalorder %s193_s9, %s193_s9 }
  0x2d   :  { %vm109_vm0 = vcmp.lt.s32.totalorder %v106_v11, 4 }
  0x2e   :  { %p200_p5 = por %p199_p4, %p198_p3 }
  0x30   :  { %p201_p6 = pnand %p200_p5, %p194_p2 }
  0x34   :  { %v146_v2 = vpop.eup %145 }
  0x35   :  { %v80_v3 = vmul.f32 0.6931472, %v146_v2 }
  0x36   :  { %v148_v4 = vpop.eup %147 }
  0x37   :  { %v81_v5 = vmax.f32 %v80_v3, -100.0  ;;  %v84_v6 = vmul.f32 0.6931472, %v148_v4 }
  0x39   :  { %v85_v8 = vmax.f32 %v84_v6, -100.0 }
  0x3b   :  { %v86_v10 = vsub.f32 %v81_v5, %v85_v8 }
  0x3d   :  { %v87_v12 = vmul.f32 %v86_v10, %v78_v9 }
  0x3f   :  { %v88_v13 = vadd.f32 %v87_v12, %v85_v8 }
  0x41   :  { %v89_v14 = vsub.f32 0.0, %v88_v13 }
  0x43   :  { %v110_v15 = vsel %vm109_vm0, %v89_v14, 0.0 }
  0x44   :  { %119 = vst [vmem:[#allocation8] sm:$0xff] %v110_v15 }
  0x45   :  { %204 = shalt.err (!%p201_p6)
}
  0x46   :  { %s205_s12 = scalar_lea.hbm %s279_s2, 128 }
  0x47   :  { %p206_p7 = scmp.ne.s32.totalorder %s279_s2, %s205_s12  ;;  %p209_p8 = scmp.lt.u32.totalorder %s205_s12, %s279_s2 }
  0x49   :  { %p211_p9 = pnand %p209_p8, %p206_p7 }
  0x4b   :  { %214 = shalt.err (!%p211_p9)
}
  0x4c   :  { %129 = dma.vmem_to_hbm [thread:$0]  %s127_s8, 128, %s279_s2, [#allocation5]  }
  0x4d   :  { %219 = dma.done.wait [#allocation5], 128  }
  0x4e   :  { %220 = vsyncadd [#allocation5], 4294967168 }
  0x4f   :  { %133 = vsyncpa [#allocation4], 1 }
  0x50   :  { %134 = vsyncpa [#allocation7], 1 }
  0x51   :  { %135 = vsyncpa [#allocation5], 1 }

</bundles_post_ra>
